<compile_context>
chip_gen: v6e
topology: v6e:2x2x1
jax: 0.10.0
libtpu: 0.0.40
codegen_flags: <defaults>
</compile_context>

<pallas_src>
import functools

import jax
import jax.numpy as jnp
from jax.experimental import pallas as pl
from jax.experimental.pallas import tpu as pltpu

EPS = 1e-5      # nn.BatchNorm3d default eps
LANE = 128      # TPU lane width


def _round_up(x, m):
    return (x + m - 1) // m * m


def _pick_batch_tile(n, hw, target_rows=512):
    """Largest divisor TN of n with TN*hw <= target (M-dim fattening)."""
    best = 1
    for t in range(1, n + 1):
        if n % t == 0 and t * hw <= max(target_rows, hw):
            best = t
    return best


def _pick_row_tile(rows, max_rows=2048):
    """Row tile for the elementwise pass: divides rows, multiple of 8."""
    if rows <= max_rows:
        return rows
    for t in range(max_rows, 7, -1):
        if rows % t == 0 and t % 8 == 0:
            return t
    return rows


def _conv_stats_kernel(x0_ref, x1_ref, x2_ref, w_ref, y_ref, sum_ref, sq_ref,
                       *, M, KC, Cout):
    """Pass 1: conv tile (kd unrolled, K=9*Cin matmuls) + BN partial sums + y cache."""
    d = pl.program_id(1)

    # Per-batch-tile stats rows are resident across the (sequential) depth axis.
    @pl.when(d == 0)
    def _init_stats():
        sum_ref[...] = jnp.zeros_like(sum_ref)
        sq_ref[...] = jnp.zeros_like(sq_ref)

    # kd reduction unrolled in-kernel: three K=9*Cin bf16 matmuls, f32 accumulate.
    acc = jnp.dot(x0_ref[...].reshape(M, KC), w_ref[0],
                  preferred_element_type=jnp.float32)
    acc = acc + jnp.dot(x1_ref[...].reshape(M, KC), w_ref[1],
                        preferred_element_type=jnp.float32)
    acc = acc + jnp.dot(x2_ref[...].reshape(M, KC), w_ref[2],
                        preferred_element_type=jnp.float32)

    # Cache conv output (bf16, true-Cout lanes) for the cheap normalize pass.
    y_ref[...] = acc[:, :Cout].reshape(y_ref.shape).astype(y_ref.dtype)

    # Per-channel column sums as MXU matvecs (not XLU sublane reductions).
    ones = jnp.ones((1, M), jnp.float32)
    sum_ref[...] += jnp.dot(ones, acc, preferred_element_type=jnp.float32)
    sq_ref[...] += jnp.dot(ones, acc * acc, preferred_element_type=jnp.float32)


def _bn_apply_kernel(y_ref, scale_ref, shift_ref, o_ref):
    """Pass 2: elementwise y * scale + shift on the cached conv output."""
    y = y_ref[...].astype(jnp.float32)
    o_ref[...] = (y * scale_ref[...] + shift_ref[...]).astype(o_ref.dtype)


def conv3d_bn(x_ncdhw, w_oidhw, gamma, beta, *, eps=EPS,
              compute_dtype=jnp.bfloat16, out_dtype=jnp.bfloat16):
    """Forward of Conv3d(k=3, s=1, p=1, bias=False) + BatchNorm3d (train mode)."""
    N, Cin, D, H, W = x_ncdhw.shape
    Cout, Cin_w, KD, KH, KW = w_oidhw.shape
    assert Cin_w == Cin and (KD, KH, KW) == (3, 3, 3)
    HW = H * W
    KC = 9 * Cin                       # in-plane (kh, kw, cin) contraction depth
    Cpad = _round_up(Cout, LANE)       # lane-dense MXU accumulator width
    TN = _pick_batch_tile(N, HW)       # batch rows folded into the matmul M dim
    M = TN * HW
    B = N // TN
    vmem_limit = 32 * 1024 * 1024

    # ---- layout glue (XLA): NDHWC, spatial pad, in-plane im2col, bf16 cast ----
    x = jnp.transpose(x_ncdhw, (0, 2, 3, 4, 1))                     # N,D,H,W,Cin
    xp = jnp.pad(x, ((0, 0), (1, 1), (1, 1), (1, 1), (0, 0)))       # pad d,h,w
    patches = [xp[:, :, kh:kh + H, kw:kw + W, :]
               for kh in range(3) for kw in range(3)]
    x_col = jnp.concatenate(patches, axis=-1)                       # N,D+2,H,W,9Cin
    x_col = x_col.reshape(N, D + 2, HW, KC).astype(compute_dtype)

    # (Cout,Cin,kd,kh,kw) -> (kd, (kh,kw,cin), Cout), zero-pad Cout -> Cpad.
    wt = jnp.transpose(w_oidhw, (2, 3, 4, 1, 0)).reshape(3, KC, Cout)
    wt = jnp.pad(wt, ((0, 0), (0, 0), (0, Cpad - Cout))).astype(compute_dtype)

    # ---- pass 1: conv + y cache + per-channel partial sums --------------------
    def x_spec(kd):
        # Depth block size 1 => block index == element index, so d+kd is the halo.
        return pl.BlockSpec((TN, 1, HW, KC),
                            lambda b, d, kd=kd: (b, d + kd, 0, 0))

    w_spec = pl.BlockSpec((3, KC, Cpad), lambda b, d: (0, 0, 0))      # resident
    y_spec = pl.BlockSpec((TN, 1, HW, Cout), lambda b, d: (b, d, 0, 0))
    stat_spec = pl.BlockSpec((1, Cpad), lambda b, d: (b, 0))

    y_bf, ysum, ysq = pl.pallas_call(
        functools.partial(_conv_stats_kernel, M=M, KC=KC, Cout=Cout),
        out_shape=(jax.ShapeDtypeStruct((N, D, HW, Cout), compute_dtype),
                   jax.ShapeDtypeStruct((B, Cpad), jnp.float32),
                   jax.ShapeDtypeStruct((B, Cpad), jnp.float32)),
        grid_spec=pltpu.PrefetchScalarGridSpec(
            num_scalar_prefetch=0, grid=(B, D),
            in_specs=[x_spec(0), x_spec(1), x_spec(2), w_spec],
            out_specs=(y_spec, stat_spec, stat_spec)),
        compiler_params=pltpu.CompilerParams(
            dimension_semantics=("parallel", "arbitrary"),
            vmem_limit_bytes=vmem_limit),
    )(x_col, x_col, x_col, wt)

    # ---- fold BN into per-channel scale/shift (O(Cout) glue) ------------------
    count = float(N * D * H * W)
    s1 = jnp.sum(ysum, axis=0)[:Cout]
    s2 = jnp.sum(ysq, axis=0)[:Cout]
    mean = s1 / count
    var = jnp.maximum(s2 / count - mean * mean, 0.0)   # biased (training) variance
    # TODO(synk): E[y^2]-mean^2 in f32 can cancel for very large N*D*H*W; use a
    #             shifted/two-pass variance if this feeds training at scale.
    scale = (gamma.astype(jnp.float32) * jax.lax.rsqrt(var + eps))[None, :]
    shift = beta.astype(jnp.float32)[None, :] - mean[None, :] * scale

    # ---- pass 2: elementwise normalize of the cached conv output --------------
    rows = N * D * HW
    TR = _pick_row_tile(rows)
    y2 = y_bf.reshape(rows, Cout)
    out2 = pl.pallas_call(
        _bn_apply_kernel,
        out_shape=jax.ShapeDtypeStruct((rows, Cout), out_dtype),
        grid_spec=pltpu.PrefetchScalarGridSpec(
            num_scalar_prefetch=0, grid=(rows // TR,),
            in_specs=[pl.BlockSpec((TR, Cout), lambda i: (i, 0)),
                      pl.BlockSpec((1, Cout), lambda i: (0, 0)),
                      pl.BlockSpec((1, Cout), lambda i: (0, 0))],
            out_specs=pl.BlockSpec((TR, Cout), lambda i: (i, 0))),
        compiler_params=pltpu.CompilerParams(
            dimension_semantics=("parallel",),
            vmem_limit_bytes=vmem_limit),
    )(y2, scale, shift)

    # ---- layout glue: back to NCDHW -------------------------------------------
    out = out2.reshape(N, D, H, W, Cout)
    return jnp.transpose(out, (0, 4, 1, 2, 3))


def reference(x, w, gamma, beta, eps=EPS):
    """Pure-JAX reference matching PyTorch Conv3d + BatchNorm3d (train mode)."""
    y = jax.lax.conv_general_dilated(
        x, w, window_strides=(1, 1, 1),
        padding=((1, 1), (1, 1), (1, 1)),
        dimension_numbers=('NCDHW', 'OIDHW', 'NCDHW'),
        precision=jax.lax.Precision.HIGHEST)
    mean = jnp.mean(y, axis=(0, 2, 3, 4), keepdims=True)
    var = jnp.mean(jnp.square(y - mean), axis=(0, 2, 3, 4), keepdims=True)
    g = gamma.reshape(1, -1, 1, 1, 1)
    b = beta.reshape(1, -1, 1, 1, 1)
    return (y - mean) * jax.lax.rsqrt(var + eps) * g + b


if __name__ == "__main__":
    key = jax.random.PRNGKey(0)
    kx, kw, kg, kb = jax.random.split(key, 4)

    # Small shapes consistent with Conv3d_BN(in_channels=4, out_channels=8).
    N, Cin, Cout, D, H, W = 2, 4, 8, 8, 8, 8
    x = jax.random.normal(kx, (N, Cin, D, H, W), dtype=jnp.float32)
    w = 0.1 * jax.random.normal(kw, (Cout, Cin, 3, 3, 3), dtype=jnp.float32)
    # Non-trivial gamma/beta so the fused affine path is actually exercised.
    gamma = 1.0 + 0.1 * jax.random.normal(kg, (Cout,), dtype=jnp.float32)
    beta = 0.1 * jax.random.normal(kb, (Cout,), dtype=jnp.float32)

    out = jax.block_until_ready(conv3d_bn(x, w, gamma, beta))
    assert out.shape == (N, Cout, D, H, W), out.shape
    out_f32 = out.astype(jnp.float32)

    # Matched-precision reference: same bf16 rounding of the conv operands as
    # the kernel's bf16 MXU path; tolerance covers the bf16 y-cache and bf16
    # output rounding of the kernel.
    x_bf = x.astype(jnp.bfloat16).astype(jnp.float32)
    w_bf = w.astype(jnp.bfloat16).astype(jnp.float32)
    ref_bf = jax.block_until_ready(reference(x_bf, w_bf, gamma, beta))
    assert jnp.allclose(out_f32, ref_bf, atol=3e-2, rtol=3e-2), \
        "mismatch vs matched-precision reference"

    # Looser sanity check vs the full-f32 reference (bf16 operand + output).
    ref_f32 = jax.block_until_ready(reference(x, w, gamma, beta))
    assert jnp.allclose(out_f32, ref_f32, atol=7e-2, rtol=7e-2), \
        "mismatch vs f32 reference"

    print("KERNEL_OK")
</pallas_src>

<mosaic_0001>
module attributes {stable_mosaic.version = 11 : i64} {
  func.func @_conv_stats_kernel(%arg0: i32, %arg1: i32, %arg2: memref<2x1x64x36xbf16, #tpu.memory_space<vmem>>, %arg3: memref<2x1x64x36xbf16, #tpu.memory_space<vmem>>, %arg4: memref<2x1x64x36xbf16, #tpu.memory_space<vmem>>, %arg5: memref<3x36x128xbf16, #tpu.memory_space<vmem>>, %arg6: memref<2x1x64x8xbf16, #tpu.memory_space<vmem>>, %arg7: memref<1x128xf32, #tpu.memory_space<vmem>>, %arg8: memref<1x128xf32, #tpu.memory_space<vmem>>) attributes {dimension_semantics = [#tpu.dimension_semantics<parallel>, #tpu.dimension_semantics<arbitrary>], iteration_bounds = array<i64: 1, 8>, scalar_prefetch = 0 : i64, scratch_operands = 0 : i64, tpu.core_type = #tpu.core_type<tc>, window_params = [{transform_indices = @transform_0, window_bounds = array<i64: 2, 1, 64, 36>}, {transform_indices = @transform_1, window_bounds = array<i64: 2, 1, 64, 36>}, {transform_indices = @transform_2, window_bounds = array<i64: 2, 1, 64, 36>}, {pipeline_mode = #tpu.pipeline_mode<synchronous>, transform_indices = @transform_3, window_bounds = array<i64: 3, 36, 128>}, {transform_indices = @transform_4, window_bounds = array<i64: 2, 1, 64, 8>}, {transform_indices = @transform_5, window_bounds = array<i64: 1, 128>}, {transform_indices = @transform_6, window_bounds = array<i64: 1, 128>}]} {
    %c0_i32 = arith.constant 0 : i32
    %0 = arith.cmpi eq, %arg1, %c0_i32 : i32
    %1 = arith.extui %0 : i1 to i32
    %c0_i32_0 = arith.constant 0 : i32
    %2 = arith.cmpi ne, %1, %c0_i32_0 : i32
    scf.if %2 {
      %cst_36 = arith.constant 0.000000e+00 : f32
      %34 = vector.broadcast %cst_36 : f32 to vector<1x128xf32>
      %c0_37 = arith.constant 0 : index
      %c0_38 = arith.constant 0 : index
      %35 = vector.load %arg7[%c0_37, %c0_38] : memref<1x128xf32, #tpu.memory_space<vmem>>, vector<1x128xf32>
      tpu.vector_store %arg7[%c0_37, %c0_38], %34 {strides = array<i32>} : memref<1x128xf32, #tpu.memory_space<vmem>>, vector<1x128xf32>,
      %cst_39 = arith.constant 0.000000e+00 : f32
      %36 = vector.broadcast %cst_39 : f32 to vector<1x128xf32>
      %c0_40 = arith.constant 0 : index
      %c0_41 = arith.constant 0 : index
      %37 = vector.load %arg8[%c0_40, %c0_41] : memref<1x128xf32, #tpu.memory_space<vmem>>, vector<1x128xf32>
      tpu.vector_store %arg8[%c0_40, %c0_41], %36 {strides = array<i32>} : memref<1x128xf32, #tpu.memory_space<vmem>>, vector<1x128xf32>,
    } else {
    }
    %c0 = arith.constant 0 : index
    %c0_1 = arith.constant 0 : index
    %c0_2 = arith.constant 0 : index
    %c0_3 = arith.constant 0 : index
    %3 = vector.load %arg2[%c0, %c0_1, %c0_2, %c0_3] : memref<2x1x64x36xbf16, #tpu.memory_space<vmem>>, vector<2x1x64x36xbf16>
    %4 = vector.shape_cast %3 : vector<2x1x64x36xbf16> to vector<128x36xbf16>
    %c0_4 = arith.constant 0 : index
    %c0_5 = arith.constant 0 : index
    %c0_6 = arith.constant 0 : index
    %5 = vector.load %arg5[%c0_4, %c0_5, %c0_6] : memref<3x36x128xbf16, #tpu.memory_space<vmem>>, vector<1x36x128xbf16>
    %6 = vector.shape_cast %5 : vector<1x36x128xbf16> to vector<36x128xbf16>
    %cst = arith.constant dense<0.000000e+00> : vector<128x128xf32>
    %7 = tpu.matmul %4, %6, %cst {dimension_numbers = #tpu.dot_dimension_numbers<[1], [0], [0], [1], [0, 0, 1, 1], [], []>} : vector<128x36xbf16>, vector<36x128xbf16>, vector<128x128xf32> -> vector<128x128xf32>
    %c0_7 = arith.constant 0 : index
    %c0_8 = arith.constant 0 : index
    %c0_9 = arith.constant 0 : index
    %c0_10 = arith.constant 0 : index
    %8 = vector.load %arg3[%c0_7, %c0_8, %c0_9, %c0_10] : memref<2x1x64x36xbf16, #tpu.memory_space<vmem>>, vector<2x1x64x36xbf16>
    %9 = vector.shape_cast %8 : vector<2x1x64x36xbf16> to vector<128x36xbf16>
    %c1 = arith.constant 1 : index
    %c0_11 = arith.constant 0 : index
    %c0_12 = arith.constant 0 : index
    %10 = vector.load %arg5[%c1, %c0_11, %c0_12] : memref<3x36x128xbf16, #tpu.memory_space<vmem>>, vector<1x36x128xbf16>
    %11 = vector.shape_cast %10 : vector<1x36x128xbf16> to vector<36x128xbf16>
    %cst_13 = arith.constant dense<0.000000e+00> : vector<128x128xf32>
    %12 = tpu.matmul %9, %11, %cst_13 {dimension_numbers = #tpu.dot_dimension_numbers<[1], [0], [0], [1], [0, 0, 1, 1], [], []>} : vector<128x36xbf16>, vector<36x128xbf16>, vector<128x128xf32> -> vector<128x128xf32>
    %13 = arith.addf %7, %12 : vector<128x128xf32>
    %c0_14 = arith.constant 0 : index
    %c0_15 = arith.constant 0 : index
    %c0_16 = arith.constant 0 : index
    %c0_17 = arith.constant 0 : index
    %14 = vector.load %arg4[%c0_14, %c0_15, %c0_16, %c0_17] : memref<2x1x64x36xbf16, #tpu.memory_space<vmem>>, vector<2x1x64x36xbf16>
    %15 = vector.shape_cast %14 : vector<2x1x64x36xbf16> to vector<128x36xbf16>
    %c2 = arith.constant 2 : index
    %c0_18 = arith.constant 0 : index
    %c0_19 = arith.constant 0 : index
    %16 = vector.load %arg5[%c2, %c0_18, %c0_19] : memref<3x36x128xbf16, #tpu.memory_space<vmem>>, vector<1x36x128xbf16>
    %17 = vector.shape_cast %16 : vector<1x36x128xbf16> to vector<36x128xbf16>
    %cst_20 = arith.constant dense<0.000000e+00> : vector<128x128xf32>
    %18 = tpu.matmul %15, %17, %cst_20 {dimension_numbers = #tpu.dot_dimension_numbers<[1], [0], [0], [1], [0, 0, 1, 1], [], []>} : vector<128x36xbf16>, vector<36x128xbf16>, vector<128x128xf32> -> vector<128x128xf32>
    %19 = arith.addf %13, %18 : vector<128x128xf32>
    %20 = vector.extract_strided_slice %19 {offsets = [0, 0], sizes = [128, 8], strides = [1, 1]} : vector<128x128xf32> to vector<128x8xf32>
    %21 = vector.shape_cast %20 : vector<128x8xf32> to vector<2x1x64x8xf32>
    %22 = arith.truncf %21 : vector<2x1x64x8xf32> to vector<2x1x64x8xbf16>
    %c0_21 = arith.constant 0 : index
    %c0_22 = arith.constant 0 : index
    %c0_23 = arith.constant 0 : index
    %c0_24 = arith.constant 0 : index
    %23 = vector.load %arg6[%c0_21, %c0_22, %c0_23, %c0_24] : memref<2x1x64x8xbf16, #tpu.memory_space<vmem>>, vector<2x1x64x8xbf16>
    tpu.vector_store %arg6[%c0_21, %c0_22, %c0_23, %c0_24], %22 {strides = array<i32>} : memref<2x1x64x8xbf16, #tpu.memory_space<vmem>>, vector<2x1x64x8xbf16>,
    %cst_25 = arith.constant 1.000000e+00 : f32
    %24 = vector.broadcast %cst_25 : f32 to vector<1x128xf32>
    %c0_26 = arith.constant 0 : index
    %c0_27 = arith.constant 0 : index
    %25 = vector.load %arg7[%c0_26, %c0_27] : memref<1x128xf32, #tpu.memory_space<vmem>>, vector<1x128xf32>
    %cst_28 = arith.constant dense<0.000000e+00> : vector<1x128xf32>
    %26 = tpu.matmul %24, %19, %cst_28 {dimension_numbers = #tpu.dot_dimension_numbers<[1], [0], [0], [1], [0, 0, 1, 1], [], []>} : vector<1x128xf32>, vector<128x128xf32>, vector<1x128xf32> -> vector<1x128xf32>
    %27 = arith.addf %25, %26 : vector<1x128xf32>
    %c0_29 = arith.constant 0 : index
    %c0_30 = arith.constant 0 : index
    %28 = vector.load %arg7[%c0_29, %c0_30] : memref<1x128xf32, #tpu.memory_space<vmem>>, vector<1x128xf32>
    tpu.vector_store %arg7[%c0_29, %c0_30], %27 {strides = array<i32>} : memref<1x128xf32, #tpu.memory_space<vmem>>, vector<1x128xf32>,
    %c0_31 = arith.constant 0 : index
    %c0_32 = arith.constant 0 : index
    %29 = vector.load %arg8[%c0_31, %c0_32] : memref<1x128xf32, #tpu.memory_space<vmem>>, vector<1x128xf32>
    %30 = arith.mulf %19, %19 : vector<128x128xf32>
    %cst_33 = arith.constant dense<0.000000e+00> : vector<1x128xf32>
    %31 = tpu.matmul %24, %30, %cst_33 {dimension_numbers = #tpu.dot_dimension_numbers<[1], [0], [0], [1], [0, 0, 1, 1], [], []>} : vector<1x128xf32>, vector<128x128xf32>, vector<1x128xf32> -> vector<1x128xf32>
    %32 = arith.addf %29, %31 : vector<1x128xf32>
    %c0_34 = arith.constant 0 : index
    %c0_35 = arith.constant 0 : index
    %33 = vector.load %arg8[%c0_34, %c0_35] : memref<1x128xf32, #tpu.memory_space<vmem>>, vector<1x128xf32>
    tpu.vector_store %arg8[%c0_34, %c0_35], %32 {strides = array<i32>} : memref<1x128xf32, #tpu.memory_space<vmem>>, vector<1x128xf32>,
    return
  }
  func.func @transform_0(%arg0: i32, %arg1: i32) -> (i32, i32, i32, i32) {
    %c0_i32 = arith.constant 0 : i32
    %0 = arith.addi %arg1, %c0_i32 : i32
    %c0_i32_0 = arith.constant 0 : i32
    %c0_i32_1 = arith.constant 0 : i32
    %c0_i32_2 = arith.constant 0 : i32
    return %arg0, %0, %c0_i32_0, %c0_i32_1 : i32, i32, i32, i32
  }
  func.func @transform_1(%arg0: i32, %arg1: i32) -> (i32, i32, i32, i32) {
    %c1_i32 = arith.constant 1 : i32
    %0 = arith.addi %arg1, %c1_i32 : i32
    %c0_i32 = arith.constant 0 : i32
    %c0_i32_0 = arith.constant 0 : i32
    %c0_i32_1 = arith.constant 0 : i32
    return %arg0, %0, %c0_i32, %c0_i32_0 : i32, i32, i32, i32
  }
  func.func @transform_2(%arg0: i32, %arg1: i32) -> (i32, i32, i32, i32) {
    %c2_i32 = arith.constant 2 : i32
    %0 = arith.addi %arg1, %c2_i32 : i32
    %c0_i32 = arith.constant 0 : i32
    %c0_i32_0 = arith.constant 0 : i32
    %c0_i32_1 = arith.constant 0 : i32
    return %arg0, %0, %c0_i32, %c0_i32_0 : i32, i32, i32, i32
  }
  func.func @transform_3(%arg0: i32, %arg1: i32) -> (i32, i32, i32) {
    %c0_i32 = arith.constant 0 : i32
    %c0_i32_0 = arith.constant 0 : i32
    %c0_i32_1 = arith.constant 0 : i32
    %c0_i32_2 = arith.constant 0 : i32
    return %c0_i32, %c0_i32_0, %c0_i32_1 : i32, i32, i32
  }
  func.func @transform_4(%arg0: i32, %arg1: i32) -> (i32, i32, i32, i32) {
    %c0_i32 = arith.constant 0 : i32
    %c0_i32_0 = arith.constant 0 : i32
    %c0_i32_1 = arith.constant 0 : i32
    return %arg0, %arg1, %c0_i32, %c0_i32_0 : i32, i32, i32, i32
  }
  func.func @transform_5(%arg0: i32, %arg1: i32) -> (i32, i32) {
    %c0_i32 = arith.constant 0 : i32
    %c0_i32_0 = arith.constant 0 : i32
    return %arg0, %c0_i32 : i32, i32
  }
  func.func @transform_6(%arg0: i32, %arg1: i32) -> (i32, i32) {
    %c0_i32 = arith.constant 0 : i32
    %c0_i32_0 = arith.constant 0 : i32
    return %arg0, %c0_i32 : i32, i32
  }
}

</mosaic_0001>

<bundles_post_ra>
// kernel: tpu_custom_call.1
= control target key start
LH: loop header
LB: loop body
LE: loop exit
PB: predicated region body
PF: predicated region fallthrough
CT: control target
= control target key end

     0   :  { %s2915_s0 = inlined_call_operand.vmem [shape: bf16[2,10,64,36], index: 0, kind: input, shape index: {}]   ;;  %s2916_s1 = inlined_call_operand.vmem [shape: bf16[2,10,64,36], index: 1, kind: input, shape index: {}]   ;;  %s2917_s2 = inlined_call_operand.vmem [shape: bf16[2,10,64,36], index: 2, kind: input, shape index: {}]   ;;  %s2918_s3 = inlined_call_operand.vmem [shape: bf16[3,36,128], index: 3, kind: input, shape index: {}]   ;;  %s2919_s4 = inlined_call_operand.vmem [shape: bf16[2,8,64,8], index: 4, kind: output, shape index: {0}]   ;;  %s2920_s5 = inlined_call_operand.hbm [shape: f32[1,128], index: 5, kind: output, shape index: {1}]   ;;  %s2921_s6 = inlined_call_operand.hbm [shape: f32[1,128], index: 6, kind: output, shape index: {2}]  }
   0x1   :  { %2922 = sst [smem:[#allocation12_spill]] %s2915_s0 }
   0x2   :  { %2923 = sst [smem:[#allocation13_spill]] %s2921_s6 }
   0x3   :  { %12 = vsyncpa [#allocation7], 0 }
   0x4   :  { %13 = vsyncpa [#allocation9], 0  ;;  %s2467_s21 = smov 0   ;;  %s2469_s22 = smov 0  }
   0x5   :  { %s2471_s23 = smov 0   ;;  %s2473_s24 = smov 0  }
   0x6   :  { %s2475_s25 = smov 0   ;;  %s2477_s26 = smov 0  }
   0x7   :  { %s2479_s27 = smov 0   ;;  %s2481_s28 = smov 0  }
   0x8   :  { %s2483_s29 = smov 0  }
   0x9 LB: > { %s1799_s30 = sadd.s32 4294967295, %s2424_s29   ;;  %s28_s7 = sadd.s32 1, %s2420_s28  ;;  %s2424_s29 = sphi %s2483_s29, %s19_s29   ;;  %s2420_s28 = sphi %s2481_s28, %s2938_s28   ;;  %s2416_s27 = sphi %s2479_s27, %s2937_s27   ;;  %s2412_s26 = sphi %s2477_s26, %s2936_s26   ;;  %s2408_s25 = sphi %s2475_s25, %s2935_s25   ;;  %s2404_s24 = sphi %s2473_s24, %s2934_s24   ;;  %s2400_s23 = sphi %s2471_s23, %s2933_s23   ;;  %s2396_s22 = sphi %s2469_s22, %s2932_s22   ;;  %s2392_s21 = sphi %s2467_s21, %s2931_s21  }
   0xa   : > { %p29_p0 = scmp.ge.s32.totalorder %s28_s7, 8  ;;  %s40_s8 = sadd.s32 1, %s2412_s26 }
   0xb   : > { %p47_p1 = scmp.ne.s32.totalorder %s2412_s26, %s2408_s25  ;;  %p48_p2 = scmp.eq.s32.totalorder %s2424_s29, 0 }
   0xc   : > { %s2518_s9 = scalar_select %p29_p0, 0, %s28_s7  }
   0xd   : > { %p2525_p3 = por %p48_p2, %p47_p1  ;;  %s70_s11 = sadd.s32 1, %s2404_s24 }
   0xe   : > { %s36_s12 = ssub.s32 %s2420_s28, %s2518_s9  ;;  %s64_s13 = sadd.s32 1, %s2518_s9 }
   0xf   : > { %p38_p4 = scmp.eq.s32.totalorder %s36_s12, 0  ;;  %s66_s14 = ssub.s32 %s28_s7, %s64_s13 }
  0x10   : > { %p68_p5 = scmp.eq.s32.totalorder %s66_s14, 0  ;;  %p77_p6 = scmp.ne.s32.totalorder %s2404_s24, %s2400_s23 }
  0x11   : > { %s2536_s15 = scalar_select %p38_p4, %s2412_s26, %s40_s8  }
  0x12   : > { %s2539_s16 = scalar_select %p68_p5, %s2404_s24, %s70_s11  }
  0x13   : > { %p2543_p7 = por %p77_p6, %p48_p2  ;;  %s93_s18 = sadd.s32 2, %s2420_s28 }
  0x14   : > { %s94_s19 = sadd.s32 2, %s2518_s9  ;;  %s100_s20 = sadd.s32 1, %s2396_s22 }
  0x15   : > { %s96_s6 = ssub.s32 %s93_s18, %s94_s19  ;;  %p107_p8 = scmp.ne.s32.totalorder %s2396_s22, %s2392_s21 }
  0x16   : > { %p98_p9 = scmp.eq.s32.totalorder %s96_s6, 0  ;;  %p2552_p10 = scmp.eq.s32.totalorder %s1799_s30, 7 }
  0x17   : > { %p2558_p11 = por %p107_p8, %p48_p2  ;;  %p1802_p13 = scmp.ge.s32.totalorder %s2424_s29, 8 }
  0x18   : > { %s2563_s8 = scalar_select %p98_p9, %s2396_s22, %s100_s20  }
  0x19   : > { %p2570_p12 = por %p2552_p10, %p47_p1  ;;  %237 = sbr.rel (%p1802_p13) target bundleno = 60 (0x3c), region = 20 }
  0x1e   : > { %240 = sbr.rel (!%p2525_p3) target bundleno = 44 (0x2c), region = 24  ;;  %s242_s6 = sand.u32 (%p2525_p3), 1, %s2412_s26  }
  0x1f   : > { %s1942_s30 = sshll.u32 (%p2525_p3), %s2420_s28, 5  ;;  %s1803_s13 = sshll.u32 (%p2525_p3), %s242_s6, 6 }
  0x20   : > { %s2929_s0 = sld [smem:[#allocation12_spill]] (%p2525_p3)  ;;  %s244_s20 = scalar_lea.vmem (%p2525_p3), [#allocation2], %s1803_s13 }
  0x26   : > { %s250_s19 = scalar_lea.vmem %s2929_s0, %s1942_s30 }
  0x27   : > { %v267_v0 = vld [vmem:[%s250_s19] sm:$0xff]   ;;  %v271_v1 = vld [vmem:[%s250_s19 + $0x8] sm:$0xff]   ;;  %v275_v2 = vld [vmem:[%s250_s19 + $0x10] sm:$0xff]  }
  0x28   : > { %268 = vst [vmem:[%s244_s20] sm:$0xff] %v267_v0   ;;  %272 = vst [vmem:[%s244_s20 + $0x8] sm:$0xff] %v271_v1   ;;  %v279_v3 = vld [vmem:[%s250_s19 + $0x18] sm:$0xff]   ;;  %v283_v4 = vld [vmem:[%s250_s19 + $0x140] sm:$0xff]  }
  0x29   : > { %276 = vst [vmem:[%s244_s20 + $0x10] sm:$0xff] %v275_v2   ;;  %v287_v5 = vld [vmem:[%s250_s19 + $0x148] sm:$0xff]   ;;  %280 = vst [vmem:[%s244_s20 + $0x18] sm:$0xff] %v279_v3   ;;  %v291_v6 = vld [vmem:[%s250_s19 + $0x150] sm:$0xff]  }
  0x2a   : > { %284 = vst [vmem:[%s244_s20 + $0x20] sm:$0xff] %v283_v4   ;;  %288 = vst [vmem:[%s244_s20 + $0x28] sm:$0xff] %v287_v5   ;;  %v295_v7 = vld [vmem:[%s250_s19 + $0x158] sm:$0xff]  }
  0x2b   : > { %292 = vst [vmem:[%s244_s20 + $0x30] sm:$0xff] %v291_v6   ;;  %296 = vst [vmem:[%s244_s20 + $0x38] sm:$0xff] %v295_v7  }
  0x2c PF: > { %354 = sbr.rel (!%p2543_p7) target bundleno = 52 (0x34), region = 65  ;;  %s356_s10 = sand.u32 (%p2543_p7), 1, %s2404_s24  }
  0x2d   : > { %s1943_s6 = sshll.u32 (%p2543_p7), %s2420_s28, 5  ;;  %s1806_s30 = sshll.u32 (%p2543_p7), %s356_s10, 6 }
  0x2e   : > { %s1693_s18 = scalar_lea.vmem (%p2543_p7), %s2916_s1, %s1943_s6  ;;  %s358_s0 = scalar_lea.vmem (%p2543_p7), [#allocation3], %s1806_s30 }
  0x2f   : > { %v1809_v8 = vld [vmem:[%s1693_s18 + $0x20] sm:$0xff] (%p2543_p7)   ;;  %v1811_v9 = vld [vmem:[%s1693_s18 + $0x28] sm:$0xff] (%p2543_p7)   ;;  %v1813_v10 = vld [vmem:[%s1693_s18 + $0x30] sm:$0xff] (%p2543_p7)  }
  0x30   : > { %383 = vst [vmem:[%s358_s0] sm:$0xff] (%p2543_p7), %v1809_v8   ;;  %387 = vst [vmem:[%s358_s0 + $0x8] sm:$0xff] (%p2543_p7), %v1811_v9   ;;  %v1815_v11 = vld [vmem:[%s1693_s18 + $0x38] sm:$0xff] (%p2543_p7)   ;;  %v1817_v12 = vld [vmem:[%s1693_s18 + $0x160] sm:$0xff] (%p2543_p7)  }
  0x31   : > { %391 = vst [vmem:[%s358_s0 + $0x10] sm:$0xff] %v1813_v10   ;;  %v1819_v13 = vld [vmem:[%s1693_s18 + $0x168] sm:$0xff]   ;;  %395 = vst [vmem:[%s358_s0 + $0x18] sm:$0xff] %v1815_v11   ;;  %v1821_v14 = vld [vmem:[%s1693_s18 + $0x170] sm:$0xff]  }
  0x32   : > { %399 = vst [vmem:[%s358_s0 + $0x20] sm:$0xff] %v1817_v12   ;;  %403 = vst [vmem:[%s358_s0 + $0x28] sm:$0xff] %v1819_v13   ;;  %v1823_v15 = vld [vmem:[%s1693_s18 + $0x178] sm:$0xff]  }
  0x33   : > { %407 = vst [vmem:[%s358_s0 + $0x30] sm:$0xff] %v1821_v14   ;;  %411 = vst [vmem:[%s358_s0 + $0x38] sm:$0xff] %v1823_v15  }
  0x34 PF: > { %469 = sbr.rel (!%p2558_p11) target bundleno = 60 (0x3c), region = 106  ;;  %s471_s17 = sand.u32 (%p2558_p11), 1, %s2396_s22  }
  0x35   : > { %s1944_s19 = sshll.u32 (%p2558_p11), %s2420_s28, 5  ;;  %s1825_s20 = sshll.u32 (%p2558_p11), %s471_s17, 6 }
  0x36   : > { %s1701_s30 = scalar_lea.vmem (%p2558_p11), %s2917_s2, %s1944_s19  ;;  %s473_s13 = scalar_lea.vmem (%p2558_p11), [#allocation4], %s1825_s20 }
  0x37   : > { %v1828_v16 = vld [vmem:[%s1701_s30 + $0x40] sm:$0xff] (%p2558_p11)   ;;  %v1830_v17 = vld [vmem:[%s1701_s30 + $0x48] sm:$0xff] (%p2558_p11)   ;;  %v1832_v18 = vld [vmem:[%s1701_s30 + $0x50] sm:$0xff] (%p2558_p11)  }
  0x38   : > { %498 = vst [vmem:[%s473_s13] sm:$0xff] (%p2558_p11), %v1828_v16   ;;  %502 = vst [vmem:[%s473_s13 + $0x8] sm:$0xff] (%p2558_p11), %v1830_v17   ;;  %v1834_v19 = vld [vmem:[%s1701_s30 + $0x58] sm:$0xff] (%p2558_p11)   ;;  %v1836_v20 = vld [vmem:[%s1701_s30 + $0x180] sm:$0xff] (%p2558_p11)  }
  0x39   : > { %506 = vst [vmem:[%s473_s13 + $0x10] sm:$0xff] %v1832_v18   ;;  %v1838_v21 = vld [vmem:[%s1701_s30 + $0x188] sm:$0xff]   ;;  %510 = vst [vmem:[%s473_s13 + $0x18] sm:$0xff] %v1834_v19   ;;  %v1840_v22 = vld [vmem:[%s1701_s30 + $0x190] sm:$0xff]  }
  0x3a   : > { %514 = vst [vmem:[%s473_s13 + $0x20] sm:$0xff] %v1836_v20   ;;  %518 = vst [vmem:[%s473_s13 + $0x28] sm:$0xff] %v1838_v21   ;;  %v1842_v23 = vld [vmem:[%s1701_s30 + $0x198] sm:$0xff]  }
  0x3b   : > { %522 = vst [vmem:[%s473_s13 + $0x30] sm:$0xff] %v1840_v22   ;;  %526 = vst [vmem:[%s473_s13 + $0x38] sm:$0xff] %v1842_v23  }
  0x3c PF: > { %p1844_p0 = scmp.ge.s32.totalorder %s2424_s29, 1  ;;  %p583_p1 = scmp.lt.s32.totalorder %s2424_s29, 9 }
  0x3e   : > { %p584_p2 = pnand %p1844_p0, %p583_p1 }
  0x3f   : > { %s590_s0 = sand.u32 (!%p584_p2), 1, %s2408_s25   ;;  %s597_s7 = sand.u32 (!%p584_p2), 1, %s2400_s23  }
  0x40   : > { %587 = sbr.rel (%p584_p2) target bundleno = 594 (0x252), region = 147  ;;  %s1845_s14 = sshll.u32 (!%p584_p2), %s590_s0, 6 }
  0x41   : > { %s1846_s18 = sshll.u32 (!%p584_p2), %s597_s7, 6  ;;  %s604_s17 = sand.u32 (!%p584_p2), 1, %s2392_s21  }
  0x42   : > { %s1847_s19 = sshll.u32 (!%p584_p2), %s604_s17, 6  ;;  %s2601_s20 = scalar_lea.vmem (!%p584_p2), [#allocation2], %s1845_s14 }
  0x43   : > { %s2603_s10 = scalar_lea.vmem (!%p584_p2), [#allocation3], %s1846_s18  ;;  %s2605_s6 = scalar_lea.vmem (!%p584_p2), [#allocation4], %s1847_s19 }
  0x44   : > { %s2607_s30 = scalar_lea.vmem (!%p584_p2), [#allocation5], %s1845_s14  ;;  %p1849_p3 = scmp.ne.s32.totalorder (!%p584_p2), %s2416_s27, 0 }
  0x46   : > { %650 = sbr.rel (%p1849_p3) target bundleno = 77 (0x4d), region = 163 }
  0x4b   : > { %v2426_v24 = vmov 0.0  }
  0x4c   : > { %651 = vst [vmem:[#allocation6] sm:$0x1] %v2426_v24  ;;  %652 = vst [vmem:[#allocation8] sm:$0x1] %v2426_v24 }
  0x4d PF: > { %v2265_v25 = vld [vmem:[%s2918_s3 + $0x24] ss:$0 sps:$4 sm:$0x33]   ;;  %vm776_vm0 = vcmask 1041408   ;;  %v2266_v26 = vld [vmem:[%s2918_s3 + $0x1c] sm:$0xff]   ;;  %vm751_vm1 = vcmask 293888  }
  0x4e   : > { %2171 = vmatprep.subr.msk.bf16.mxu0 %vm776_vm0, %v2265_v25  ;;  %2172 = vmatprep.subr.msk.bf16.mxu1 %vm776_vm0, %v2265_v25  ;;  %v778_v27 = vsel %vm776_vm0, %v2265_v25, 0  ;;  %v2267_v28 = vld [vmem:[%s2918_s3 + $0x14] sm:$0xff]   ;;  %v2268_v29 = vld [vmem:[%s2603_s10] sm:$0xff]   ;;  %v2272_v31 = vld [vmem:[%s2918_s3 + $0x10] ss:$0 sps:$4 sm:$0x33]  }
  0x4f   : > { %2030 = vmatpush3.bf16.msra.mxu0 %v778_v27  ;;  %2168 = vmatpush3.bf16.msra.mxu1 %v778_v27  ;;  %v2269_v30 = vld [vmem:[%s2603_s10 + $0x20] sm:$0xff]   ;;  %v2270_v32 = vld [vmem:[%s2603_s10 + $0x8] sm:$0xff]   ;;  %v2273_v33 = vld [vmem:[%s2918_s3 + $0x38] ss:$0 sps:$4 sm:$0x33]   ;;  %v957_v35 = vsel %vm776_vm0, %v2272_v31, 0 }
  0x50   : > { %2031 = vmatprep.subr.bf16.mxu0 %v2266_v26  ;;  %2166 = vmatprep.subr.bf16.mxu1 %v2266_v26  ;;  %v2271_v34 = vld [vmem:[%s2603_s10 + $0x28] sm:$0xff]   ;;  %v1158_v36 = vsel %vm776_vm0, %v2273_v33, 0  ;;  %v2275_v38 = vld [vmem:[%s2603_s10 + $0x10] sm:$0xff]   ;;  %v2280_v41 = vld [vmem:[%s2918_s3] sm:$0xff]   ;;  %v2427_v61 = vmov 0.0   ;;  %vm2428_vm2 = vmmov 0  }
  0x51   : > { %2035 = vmatprep.mubr.msk.bf16.mxu0 %vm751_vm1, %v2268_v29  ;;  %2043 = vmatprep.mubr.msk.bf16.mxu1 %vm751_vm1, %v2269_v30  ;;  %v2274_v37 = vld [vmem:[%s2918_s3 + $0x8] sm:$0xff]   ;;  %v2276_v39 = vld [vmem:[%s2603_s10 + $0x30] sm:$0xff]   ;;  %v2277_v43 = vld [vmem:[%s2603_s10 + $0x18] sm:$0xff]   ;;  %vm1337_vm3 = vcmask 60416  }
  0x52   : > { %v2279_v40 = vld [vmem:[%s2918_s3 + $0x30] sm:$0xff]   ;;  %v2281_v42 = vld [vmem:[%s2918_s3 + $0x28] sm:$0xff]   ;;  %v2278_v44 = vld [vmem:[%s2603_s10 + $0x38] sm:$0xff]  }
  0x53   : > { %2032 = vmatpush3.bf16.msra.mxu0 %v2266_v26  ;;  %2169 = vmatpush3.bf16.msra.mxu1 %v2266_v26  ;;  %v2282_v45 = vld [vmem:[%s2601_s20] sm:$0xff]   ;;  %v2284_v47 = vld [vmem:[%s2601_s20 + $0x8] sm:$0xff]   ;;  %v2286_v49 = vld [vmem:[%s2601_s20 + $0x10] sm:$0xff]  }
  0x54   : > { %2033 = vmatprep.subr.bf16.mxu0 %v2267_v28  ;;  %2167 = vmatprep.subr.bf16.mxu1 %v2267_v28  ;;  %v2283_v46 = vld [vmem:[%s2605_s6] sm:$0xff]   ;;  %v2285_v48 = vld [vmem:[%s2605_s6 + $0x8] sm:$0xff]   ;;  %v2287_v50 = vld [vmem:[%s2605_s6 + $0x10] sm:$0xff]  }
  0x55   : > { %v2288_v51 = vld [vmem:[%s2601_s20 + $0x18] sm:$0xff]   ;;  %v2290_v53 = vld [vmem:[%s2601_s20 + $0x20] sm:$0xff]   ;;  %v2292_v55 = vld [vmem:[%s2601_s20 + $0x28] sm:$0xff]  }
  0x56   : > { %v2289_v52 = vld [vmem:[%s2605_s6 + $0x18] sm:$0xff]   ;;  %v2291_v54 = vld [vmem:[%s2605_s6 + $0x20] sm:$0xff]   ;;  %v2293_v56 = vld [vmem:[%s2605_s6 + $0x28] sm:$0xff]  }
  0x57   : > { %2034 = vmatpush3.bf16.msra.mxu0 %v2267_v28  ;;  %2170 = vmatpush3.bf16.msra.mxu1 %v2267_v28  ;;  %v2294_v57 = vld [vmem:[%s2601_s20 + $0x30] sm:$0xff]   ;;  %v2296_v59 = vld [vmem:[%s2601_s20 + $0x38] sm:$0xff]   ;;  %s1961_s20 = sshll.u32 (%p2570_p12), %s2416_s27, 5 }
  0x58   : > { %2173 = vmatprep.subr.msk.bf16.mxu1 %vm776_vm0, %v2272_v31  ;;  %2174 = vmatprep.subr.msk.bf16.mxu0 %vm776_vm0, %v2273_v33  ;;  %v2295_v58 = vld [vmem:[%s2605_s6 + $0x30] sm:$0xff]   ;;  %v2297_v60 = vld [vmem:[%s2605_s6 + $0x38] sm:$0xff]   ;;  %s1528_s17 = scalar_lea.vmem (%p2570_p12), %s2919_s4, %s1961_s20 }
  0x5a   : > { %2036 = vmatmul.mubr.msk.bf16.vlgmr.msra.gmra.mxu0 %vm751_vm1, %v2270_v32  ;;  %2044 = vmatmul.mubr.msk.bf16.vlgmr.msra.gmra.mxu1 %vm751_vm1, %v2271_v34 }
  0x5b   : > { %2052 = vmatpush3.bf16.msra.mxu1 %v957_v35  ;;  %2074 = vmatpush3.bf16.msra.mxu0 %v1158_v36 }
  0x5c   : > { %2053 = vmatprep.subr.bf16.mxu1 %v2274_v37  ;;  %2039 = vmatprep.mubr.msk.bf16.mxu0 %vm751_vm1, %v2275_v38 }
  0x5d   : > { %2047 = vmatprep.mubr.msk.bf16.mxu1 %vm751_vm1, %v2276_v39  ;;  %2075 = vmatprep.subr.bf16.mxu0 %v2279_v40 }
  0x5f   : > { %2054 = vmatpush3.bf16.msra.mxu1 %v2274_v37  ;;  %2076 = vmatpush3.bf16.msra.mxu0 %v2279_v40 }
  0x60   : > { %2055 = vmatprep.subr.bf16.mxu1 %v2280_v41  ;;  %2077 = vmatprep.subr.bf16.mxu0 %v2281_v42 }
  0x62   : > { %2040 = vmatmul.mubr.msk.bf16.gmra.mxu0 %vm751_vm1, %v2277_v43  ;;  %2048 = vmatmul.mubr.msk.bf16.gmra.mxu1 %vm751_vm1, %v2278_v44 }
  0x63   : > { %2056 = vmatpush3.bf16.msra.mxu1 %v2280_v41  ;;  %2078 = vmatpush3.bf16.msra.mxu0 %v2281_v42 }
  0x64   : > { %2057 = vmatprep.mubr.msk.bf16.mxu1 %vm751_vm1, %v2282_v45  ;;  %2079 = vmatprep.mubr.msk.bf16.mxu0 %vm751_vm1, %v2283_v46 }
  0x65   : > { %2095 = vmatprep.subr.mxu1 %v2427_v61  ;;  %2130 = vmatprep.subr.mxu0 %v2427_v61 }
  0x6a   : > { %2058 = vmatmul.mubr.msk.bf16.vlgmr.msra.gmra.mxu1 %vm751_vm1, %v2284_v47  ;;  %2080 = vmatmul.mubr.msk.bf16.vlgmr.msra.gmra.mxu0 %vm751_vm1, %v2285_v48 }
  0x6b   : > { %2061 = vmatprep.mubr.msk.bf16.mxu1 %vm751_vm1, %v2286_v49  ;;  %2083 = vmatprep.mubr.msk.bf16.mxu0 %vm751_vm1, %v2287_v50 }
  0x72   : > { %2062 = vmatmul.mubr.msk.bf16.gmra.mxu1 %vm751_vm1, %v2288_v51  ;;  %2084 = vmatmul.mubr.msk.bf16.gmra.mxu0 %vm751_vm1, %v2289_v52 }
  0x73   : > { %2065 = vmatprep.mubr.msk.bf16.mxu1 %vm751_vm1, %v2290_v53  ;;  %2087 = vmatprep.mubr.msk.bf16.mxu0 %vm751_vm1, %v2291_v54 }
  0x7a   : > { %2066 = vmatmul.mubr.msk.bf16.gmra.mxu1 %vm751_vm1, %v2292_v55  ;;  %2088 = vmatmul.mubr.msk.bf16.gmra.mxu0 %vm751_vm1, %v2293_v56 }
  0x7b   : > { %2069 = vmatprep.mubr.msk.bf16.mxu1 %vm751_vm1, %v2294_v57  ;;  %2091 = vmatprep.mubr.msk.bf16.mxu0 %vm751_vm1, %v2295_v58 }
  0x82   : > { %2070 = vmatmul.mubr.msk.bf16.gmra.mxu1 %vm751_vm1, %v2296_v59  ;;  %2092 = vmatmul.mubr.msk.bf16.gmra.mxu0 %vm751_vm1, %v2297_v60 }
  0x83   : > { %2127 = vmatprep.mubr.msk.f32.mxu1 %vm2428_vm2, %v2427_v61  ;;  %2162 = vmatprep.mubr.msk.f32.mxu0 %vm2428_vm2, %v2427_v61 }
 0x11a   : > { %v2037_v62 = vpop.f32.mrf.mxu0  ;;  %v2696_v63 = vpop.f32.mrf.mxu1 }
 0x11c   : > { %v814_v0 = vpop.f32.mrf.mxu0  ;;  %v2698_v1 = vpop.f32.mrf.mxu1 }
 0x11e   : > { %v2038_v2 = vpop.f32.mrf.mxu0  ;;  %v2700_v3 = vpop.f32.mrf.mxu1 }
 0x120   : > { %v817_v4 = vpop.f32.mrf.mxu0  ;;  %v2702_v5 = vpop.f32.mrf.mxu1 }
 0x122   : > { %v2041_v6 = vpop.f32.mrf.mxu0  ;;  %v2704_v7 = vpop.f32.mrf.mxu1 }
 0x124   : > { %v830_v8 = vpop.f32.mrf.mxu0  ;;  %v2706_v9 = vpop.f32.mrf.mxu1 }
 0x126   : > { %v2042_v10 = vpop.f32.mrf.mxu0  ;;  %v2708_v11 = vpop.f32.mrf.mxu1 }
 0x128   : > { %v833_v12 = vpop.f32.mrf.mxu0  ;;  %v2710_v13 = vpop.f32.mrf.mxu1 }
 0x12a   : > { %v2059_v14 = vpop.f32.mrf.mxu1  ;;  %v2081_v15 = vpop.f32.mrf.mxu0 }
 0x12b   : > { %v1002_v16 = vadd.f32 %v2059_v14, %v2037_v62 }
 0x12c   : > { %v993_v17 = vpop.f32.mrf.mxu1  ;;  %v1194_v18 = vpop.f32.mrf.mxu0 }
 0x12d   : > { %v2712_v19 = vadd.f32 %v2081_v15, %v1002_v16  ;;  %v994_v20 = vadd.f32 %v993_v17, %v814_v0 }
 0x12e   : > { %v2060_v21 = vpop.f32.mrf.mxu1  ;;  %v2082_v22 = vpop.f32.mrf.mxu0 }
 0x12f   : > { %v1947_v23 = vpack.c.bf16 %v2712_v19, %v2712_v19  ;;  %v2716_v24 = vadd.f32 %v1194_v18, %v994_v20  ;;  %v1005_v25 = vadd.f32 %v2060_v21, %v2038_v2 }
 0x130   : > { %v996_v26 = vpop.f32.mrf.mxu1  ;;  %v1197_v27 = vpop.f32.mrf.mxu0 }
 0x131   : > { %1340 = vst.msk [vmem:[%s2607_s30 + $0x8] sm:$0xf] %vm1337_vm3, %v1947_v23  ;;  %v1945_v28 = vpack.c.bf16 %v2716_v24, %v2716_v24  ;;  %v2722_v29 = vadd.f32 %v2082_v22, %v1005_v25  ;;  %v997_v30 = vadd.f32 %v996_v26, %v817_v4 }
 0x132   : > { %v2063_v31 = vpop.f32.mrf.mxu1  ;;  %v2085_v32 = vpop.f32.mrf.mxu0 }
 0x133   : > { %1338 = vst.msk [vmem:[%s2607_s30] sm:$0xf] %vm1337_vm3, %v1945_v28  ;;  %v1948_v33 = vpack.c.bf16 %v2722_v29, %v2722_v29  ;;  %v2728_v34 = vadd.f32 %v1197_v27, %v997_v30  ;;  %v1018_v35 = vadd.f32 %v2063_v31, %v2041_v6 }
 0x134   : > { %v1009_v36 = vpop.f32.mrf.mxu1  ;;  %v1210_v37 = vpop.f32.mrf.mxu0 }
 0x135   : > { %1341 = vst.msk [vmem:[%s2607_s30 + $0xc] sm:$0xf] %vm1337_vm3, %v1948_v33  ;;  %v1946_v38 = vpack.c.bf16 %v2728_v34, %v2728_v34  ;;  %v2734_v39 = vadd.f32 %v2085_v32, %v1018_v35  ;;  %v1010_v40 = vadd.f32 %v1009_v36, %v830_v8 }
 0x136   : > { %v2064_v41 = vpop.f32.mrf.mxu1  ;;  %v2086_v42 = vpop.f32.mrf.mxu0 }
 0x137   : > { %1339 = vst.msk [vmem:[%s2607_s30 + $0x4] sm:$0xf] %vm1337_vm3, %v1946_v38  ;;  %v1951_v43 = vpack.c.bf16 %v2734_v39, %v2734_v39  ;;  %v2740_v44 = vadd.f32 %v1210_v37, %v1010_v40  ;;  %v1021_v45 = vadd.f32 %v2064_v41, %v2042_v10 }
 0x138   : > { %v1012_v46 = vpop.f32.mrf.mxu1  ;;  %v1213_v47 = vpop.f32.mrf.mxu0 }
 0x139   : > { %1344 = vst.msk [vmem:[%s2607_s30 + $0x18] sm:$0xf] %vm1337_vm3, %v1951_v43  ;;  %v1949_v48 = vpack.c.bf16 %v2740_v44, %v2740_v44  ;;  %v2746_v49 = vadd.f32 %v2086_v42, %v1021_v45  ;;  %v1013_v50 = vadd.f32 %v1012_v46, %v833_v12  ;;  %v1434_v46 = vmul.f32 %v2734_v39, %v2734_v39 }
 0x13a   : > { %v2067_v51 = vpop.f32.mrf.mxu1  ;;  %v2089_v52 = vpop.f32.mrf.mxu0 }
 0x13b   : > { %1342 = vst.msk [vmem:[%s2607_s30 + $0x10] sm:$0xf] %vm1337_vm3, %v1949_v48  ;;  %v1952_v53 = vpack.c.bf16 %v2746_v49, %v2746_v49  ;;  %v2752_v54 = vadd.f32 %v1213_v47, %v1013_v50  ;;  %v1034_v55 = vadd.f32 %v2067_v51, %v2696_v63  ;;  %v1435_v45 = vmul.f32 %v2746_v49, %v2746_v49  ;;  %v1354_v50 = vld [vmem:[#allocation6] sm:$0x1] }
 0x13c   : > { %v1025_v56 = vpop.f32.mrf.mxu1  ;;  %v1226_v57 = vpop.f32.mrf.mxu0  ;;  %v1432_v48 = vmul.f32 %v2740_v44, %v2740_v44 }
 0x13d   : > { %1345 = vst.msk [vmem:[%s2607_s30 + $0x1c] sm:$0xf] %vm1337_vm3, %v1952_v53  ;;  %v1950_v58 = vpack.c.bf16 %v2752_v54, %v2752_v54  ;;  %v2759_v59 = vadd.f32 %v2089_v52, %v1034_v55  ;;  %v1026_v60 = vadd.f32 %v1025_v56, %v2698_v1  ;;  %v1433_v47 = vmul.f32 %v2752_v54, %v2752_v54 }
 0x13e   : > { %v2068_v62 = vpop.f32.mrf.mxu1  ;;  %v2090_v0 = vpop.f32.mrf.mxu0 }
 0x13f   : > { %1343 = vst.msk [vmem:[%s2607_s30 + $0x14] sm:$0xf] %vm1337_vm3, %v1950_v58  ;;  %v1955_v2 = vpack.c.bf16 %v2759_v59, %v2759_v59  ;;  %v2766_v63 = vadd.f32 %v1226_v57, %v1026_v60  ;;  %v1037_v4 = vadd.f32 %v2068_v62, %v2700_v3  ;;  %v1438_v41 = vmul.f32 %v2759_v59, %v2759_v59 }
 0x140   : > { %v1028_v6 = vpop.f32.mrf.mxu1  ;;  %v1229_v8 = vpop.f32.mrf.mxu0 }
 0x141   : > { %1348 = vst.msk [vmem:[%s2607_s30 + $0x28] sm:$0xf] %vm1337_vm3, %v1955_v2  ;;  %v1953_v10 = vpack.c.bf16 %v2766_v63, %v2766_v63  ;;  %v1268_v1 = vadd.f32 %v2090_v0, %v1037_v4  ;;  %v1029_v12 = vadd.f32 %v1028_v6, %v2702_v5  ;;  %v1436_v43 = vmul.f32 %v2766_v63, %v2766_v63 }
 0x142   : > { %v2071_v14 = vpop.f32.mrf.mxu1  ;;  %v2093_v15 = vpop.f32.mrf.mxu0 }
 0x143   : > { %1346 = vst.msk [vmem:[%s2607_s30 + $0x20] sm:$0xf] %vm1337_vm3, %v1953_v10  ;;  %v1956_v16 = vpack.c.bf16 %v1268_v1, %v1268_v1  ;;  %v1266_v17 = vadd.f32 %v1229_v8, %v1029_v12  ;;  %v1050_v3 = vadd.f32 %v2071_v14, %v2704_v7  ;;  %v1439_v40 = vmul.f32 %v1268_v1, %v1268_v1 }
 0x144   : > { %v1041_v18 = vpop.f32.mrf.mxu1  ;;  %v1242_v20 = vpop.f32.mrf.mxu0  ;;  %v1557_v58 = vld [vmem:[%s2607_s30 + $0x18] sm:$0xff] (%p2570_p12)  }
 0x145   : > { %1349 = vst.msk [vmem:[%s2607_s30 + $0x2c] sm:$0xf] %vm1337_vm3, %v1956_v16  ;;  %v1954_v21 = vpack.c.bf16 %v1266_v17, %v1266_v17  ;;  %v1271_v22 = vadd.f32 %v2093_v15, %v1050_v3  ;;  %v1042_v23 = vadd.f32 %v1041_v18, %v2706_v9  ;;  %v1437_v42 = vmul.f32 %v1266_v17, %v1266_v17 }
 0x146   : > { %v2072_v25 = vpop.f32.mrf.mxu1  ;;  %v2094_v5 = vpop.f32.mrf.mxu0  ;;  %v1553_v57 = vld [vmem:[%s2607_s30 + $0x10] sm:$0xff] (%p2570_p12)   ;;  %1558 = vst [vmem:[%s1528_s17 + $0x18] sm:$0xff] (%p2570_p12), %v1557_v58  }
 0x147   : > { %1347 = vst.msk [vmem:[%s2607_s30 + $0x24] sm:$0xf] %vm1337_vm3, %v1954_v21  ;;  %v1959_v26 = vpack.c.bf16 %v1271_v22, %v1271_v22  ;;  %v1269_v27 = vadd.f32 %v1242_v20, %v1042_v23  ;;  %v1053_v28 = vadd.f32 %v2072_v25, %v2708_v11  ;;  %v1442_v37 = vmul.f32 %v1271_v22, %v1271_v22 }
 0x148   : > { %v1044_v30 = vpop.f32.mrf.mxu1  ;;  %v1245_v33 = vpop.f32.mrf.mxu0  ;;  %1554 = vst [vmem:[%s1528_s17 + $0x10] sm:$0xff] (%p2570_p12), %v1553_v57  }
 0x149   : > { %1352 = vst.msk [vmem:[%s2607_s30 + $0x38] sm:$0xf] %vm1337_vm3, %v1959_v26  ;;  %v1957_v7 = vpack.c.bf16 %v1269_v27, %v1269_v27  ;;  %v1272_v31 = vadd.f32 %v2094_v5, %v1053_v28  ;;  %v1045_v32 = vadd.f32 %v1044_v30, %v2710_v13  ;;  %v1440_v38 = vmul.f32 %v1269_v27, %v1269_v27 }
 0x14b   : > { %1350 = vst.msk [vmem:[%s2607_s30 + $0x30] sm:$0xf] %vm1337_vm3, %v1957_v7  ;;  %v1960_v9 = vpack.c.bf16 %v1272_v31, %v1272_v31  ;;  %v1443_v35 = vmul.f32 %v1272_v31, %v1272_v31  ;;  %v1270_v36 = vadd.f32 %v1245_v33, %v1045_v32  ;;  %2096 = vmatpush3.msra.mxu1 %v1272_v31 }
 0x14c   : > { %2097 = vmatprep.subr.mxu1 %v2427_v61  ;;  %v1565_v60 = vld [vmem:[%s2607_s30 + $0x28] sm:$0xff] (%p2570_p12)  }
 0x14d   : > { %1353 = vst.msk [vmem:[%s2607_s30 + $0x3c] sm:$0xf] %vm1337_vm3, %v1960_v9  ;;  %v1958_v11 = vpack.c.bf16 %v1270_v36, %v1270_v36  ;;  %2098 = vmatpush3.msra.mxu1 %v1271_v22  ;;  %2131 = vmatpush3.msra.mxu0 %v1443_v35  ;;  %v1441_v13 = vmul.f32 %v1270_v36, %v1270_v36  ;;  %1566 = vst [vmem:[%s1528_s17 + $0x108] sm:$0xff] (%p2570_p12), %v1565_v60  }
 0x14e   : > { %2099 = vmatprep.subr.mxu1 %v2427_v61  ;;  %2132 = vmatprep.subr.mxu0 %v2427_v61 }
 0x14f   : > { %1351 = vst.msk [vmem:[%s2607_s30 + $0x34] sm:$0xf] %vm1337_vm3, %v1958_v11  ;;  %2100 = vmatpush3.msra.mxu1 %v1270_v36  ;;  %2133 = vmatpush3.msra.mxu0 %v1442_v37 }
 0x150   : > { %2101 = vmatprep.subr.mxu1 %v2427_v61  ;;  %2134 = vmatprep.subr.mxu0 %v2427_v61 }
 0x151   : > { %2102 = vmatpush3.msra.mxu1 %v1269_v27  ;;  %2135 = vmatpush3.msra.mxu0 %v1441_v13 }
 0x152   : > { %2103 = vmatprep.subr.mxu1 %v2427_v61  ;;  %2136 = vmatprep.subr.mxu0 %v2427_v61 }
 0x153   : > { %2104 = vmatpush3.msra.mxu1 %v1268_v1  ;;  %2137 = vmatpush3.msra.mxu0 %v1440_v38 }
 0x154   : > { %2105 = vmatprep.subr.mxu1 %v2427_v61  ;;  %2138 = vmatprep.subr.mxu0 %v2427_v61  ;;  %v1573_v0 = vld [vmem:[%s2607_s30 + $0x38] sm:$0xff] (%p2570_p12)  }
 0x155   : > { %2106 = vmatpush3.msra.mxu1 %v2759_v59  ;;  %2139 = vmatpush3.msra.mxu0 %v1439_v40  ;;  %v1561_v59 = vld [vmem:[%s2607_s30 + $0x20] sm:$0xff] (%p2570_p12)   ;;  %1574 = vst [vmem:[%s1528_s17 + $0x118] sm:$0xff] (%p2570_p12), %v1573_v0  }
 0x156   : > { %2107 = vmatprep.subr.mxu1 %v2427_v61  ;;  %2140 = vmatprep.subr.mxu0 %v2427_v61  ;;  %1562 = vst [vmem:[%s1528_s17 + $0x100] sm:$0xff] (%p2570_p12), %v1561_v59   ;;  %v1569_v62 = vld [vmem:[%s2607_s30 + $0x30] sm:$0xff] (%p2570_p12)  }
 0x157   : > { %2108 = vmatpush3.msra.mxu1 %v1266_v17  ;;  %2141 = vmatpush3.msra.mxu0 %v1438_v41  ;;  %1570 = vst [vmem:[%s1528_s17 + $0x110] sm:$0xff] (%p2570_p12), %v1569_v62  }
 0x158   : > { %2109 = vmatprep.subr.mxu1 %v2427_v61  ;;  %2142 = vmatprep.subr.mxu0 %v2427_v61 }
 0x159   : > { %2110 = vmatpush3.msra.mxu1 %v2766_v63  ;;  %2143 = vmatpush3.msra.mxu0 %v1437_v42 }
 0x15a   : > { %2111 = vmatprep.subr.mxu1 %v2427_v61  ;;  %2144 = vmatprep.subr.mxu0 %v2427_v61 }
 0x15b   : > { %2112 = vmatpush3.msra.mxu1 %v2746_v49  ;;  %2145 = vmatpush3.msra.mxu0 %v1436_v43  ;;  %v1430_v49 = vmul.f32 %v2712_v19, %v2712_v19 }
 0x15c   : > { %2113 = vmatprep.subr.mxu1 %v2427_v61  ;;  %2146 = vmatprep.subr.mxu0 %v2427_v61 }
 0x15d   : > { %2114 = vmatpush3.msra.mxu1 %v2734_v39  ;;  %2147 = vmatpush3.msra.mxu0 %v1435_v45  ;;  %v1431_v39 = vmul.f32 %v2722_v29, %v2722_v29 }
 0x15e   : > { %2115 = vmatprep.subr.mxu1 %v2427_v61  ;;  %2148 = vmatprep.subr.mxu0 %v2427_v61 }
 0x15f   : > { %2116 = vmatpush3.msra.mxu1 %v2752_v54  ;;  %2149 = vmatpush3.msra.mxu0 %v1434_v46 }
 0x160   : > { %2117 = vmatprep.subr.mxu1 %v2427_v61  ;;  %2150 = vmatprep.subr.mxu0 %v2427_v61 }
 0x161   : > { %2118 = vmatpush3.msra.mxu1 %v2740_v44  ;;  %2151 = vmatpush3.msra.mxu0 %v1433_v47  ;;  %v1429_v44 = vmul.f32 %v2728_v34, %v2728_v34 }
 0x162   : > { %2119 = vmatprep.subr.mxu1 %v2427_v61  ;;  %2152 = vmatprep.subr.mxu0 %v2427_v61 }
 0x163   : > { %2120 = vmatpush3.msra.mxu1 %v2722_v29  ;;  %2153 = vmatpush3.msra.mxu0 %v1432_v48  ;;  %v1428_v29 = vmul.f32 %v2716_v24, %v2716_v24 }
 0x164   : > { %2121 = vmatprep.subr.mxu1 %v2427_v61  ;;  %2154 = vmatprep.subr.mxu0 %v2427_v61 }
 0x165   : > { %2122 = vmatpush3.msra.mxu1 %v2712_v19  ;;  %2155 = vmatpush3.msra.mxu0 %v1431_v39  ;;  %v2429_v19 = vmov 1.0  }
 0x166   : > { %2123 = vmatprep.subr.mxu1 %v2427_v61  ;;  %2156 = vmatprep.subr.mxu0 %v2427_v61 }
 0x167   : > { %2124 = vmatpush3.msra.mxu1 %v2728_v34  ;;  %2157 = vmatpush3.msra.mxu0 %v1430_v49  ;;  %v1427_v34 = vld [vmem:[#allocation8] sm:$0x1] }
 0x168   : > { %2125 = vmatprep.subr.mxu1 %v2427_v61  ;;  %2158 = vmatprep.subr.mxu0 %v2427_v61 }
 0x169   : > { %2126 = vmatpush3.msra.mxu1 %v2716_v24  ;;  %2159 = vmatpush3.msra.mxu0 %v1429_v44  ;;  %v1549_v24 = vld [vmem:[%s2607_s30 + $0x8] sm:$0xff] (%p2570_p12)  }
 0x16a   : > { %2160 = vmatprep.subr.mxu0 %v2427_v61  ;;  %2128 = vmatmul.mubr.f32.vlgmr.msra.gmra.mxu1 %v2429_v19  ;;  %v1545_v61 = vld [vmem:[%s2607_s30] sm:$0xff] (%p2570_p12)   ;;  %1550 = vst [vmem:[%s1528_s17 + $0x8] sm:$0xff] (%p2570_p12), %v1549_v24  }
 0x16b   : > { %2161 = vmatpush3.msra.mxu0 %v1428_v29  ;;  %1546 = vst [vmem:[%s1528_s17] sm:$0xff] (%p2570_p12), %v1545_v61  }
 0x16c   : > { %2163 = vmatmul.mubr.f32.vlgmr.msra.gmra.mxu0 %v2429_v19 }
 0x22a   : > { %v1421_v51 = vpop.f32.mrf.mxu1 }
 0x22b   : > { %v1425_v52 = vadd.f32 %v1421_v51, %v1354_v50  ;;  %1522 = sbr.rel (!%p2570_p12) target bundleno = 560 (0x230), region = 167 }
 0x22c   : > { %v1510_v53 = vpop.f32.mrf.mxu0  ;;  %v2129_v54 = vpop.f32.mrf.mxu1 }
 0x22d   : > { %1426 = vst [vmem:[#allocation6] sm:$0x1] %v1425_v52  ;;  %v1514_v55 = vadd.f32 %v1510_v53, %v1427_v34 }
 0x22e   : > { %v2164_v56 = vpop.f32.mrf.mxu0 }
 0x22f   : > { %1515 = vst [vmem:[#allocation8] sm:$0x1] %v1514_v55 }
 0x230 PF: > { %s2430_s27 = smov [#allocation6]   ;;  %s2431_s19 = smov [#allocation8]  }
 0x231   : > { %s1639_s11 = sshll.u32 %s2430_s27, 4  ;;  %s1652_s23 = sshll.u32 %s2431_s19, 4  ;;  %s1640_s11 = int_to_ptr.vmem [resolvable:$true] %s1639_s11  ;;  %s1653_s23 = int_to_ptr.vmem [resolvable:$true] %s1652_s23 }
 0x232   : > { %s2298_s25 = scalar_lea.vmem %s1640_s11, 16  ;;  %s2304_s21 = scalar_lea.vmem %s1640_s11, 32 }
 0x233   : > { %p2299_p4 = scmp.ne.s32.totalorder %s1640_s11, %s2298_s25  ;;  %p2305_p7 = scmp.lt.s32.totalorder %s1640_s11, %s1640_s11 }
 0x234   : > { %p2306_p8 = scmp.lt.s32.totalorder %s2304_s21, %s2298_s25 }
 0x235   : > { %p2300_p5 = pnand %p2299_p4, %p2552_p10 }
 0x236   : > { %p2307_p9 = por %p2306_p8, %p2305_p7 }
 0x237   : > { %p2301_p6 = pneg %p2300_p5 }
 0x239   : > { %p2308_p11 = pnand %p2307_p9, %p2301_p6 }
 0x23b   : > { %2311 = shalt.err (!%p2308_p11)
}
 0x23c   : > { %2176 = dma.vmem_to_hbm [thread:$0]  (%p2552_p10), %s1640_s11, 16, %s2920_s5, [#allocation7]  }
 0x23d   : > { %s2322_s0 = scalar_lea.vmem %s1653_s23, 16  ;;  %s2328_s7 = scalar_lea.vmem %s1653_s23, 32 }
 0x23e   : > { %p2323_p12 = scmp.ne.s32.totalorder %s1653_s23, %s2322_s0  ;;  %p2329_p1 = scmp.lt.s32.totalorder %s1653_s23, %s1653_s23 }
 0x23f   : > { %p2330_p2 = scmp.lt.s32.totalorder %s2328_s7, %s2322_s0 }
 0x240   : > { %p2324_p13 = pnand %p2323_p12, %p2552_p10 }
 0x241   : > { %p2331_p3 = por %p2330_p2, %p2329_p1 }
 0x242   : > { %p2325_p0 = pneg %p2324_p13 }
 0x244   : > { %p2332_p4 = pnand %p2331_p3, %p2325_p0 }
 0x246   : > { %2335 = shalt.err (!%p2332_p4)
}
 0x247   : > { %s2930_s20 = sld [smem:[#allocation13_spill]] }
 0x24d   : > { %2178 = dma.vmem_to_hbm [thread:$0]  (%p2552_p10), %s1653_s23, 16, %s2930_s20, [#allocation9]  }
 0x24e   : > { %2383 = dma.done.wait (%p2552_p10), [#allocation7], 16  }
 0x24f   : > { %2385 = vsyncadd (%p2552_p10), [#allocation7], 4294967280 }
 0x250   : > { %2387 = dma.done.wait (%p2552_p10), [#allocation9], 16  }
 0x251   : > { %2389 = vsyncadd (%p2552_p10), [#allocation9], 4294967280 }
 0x252 PF: > { %s19_s29 = sadd.s32 1, %s2424_s29   ;;  %s2931_s21 = smov %s2396_s22 }
 0x253   : > { %p16_p5 = scmp.ge.s32.totalorder %s19_s29, 10   ;;  %s2932_s22 = smov %s2563_s8 }
 0x254   : > { %s2933_s23 = smov %s2404_s24  ;;  %s2934_s24 = smov %s2539_s16 }
 0x255   : > { %s2935_s25 = smov %s2412_s26  ;;  %s2936_s26 = smov %s2536_s15 }
 0x256   : > { %s2937_s27 = smov %s2420_s28  ;;  %s2938_s28 = smov %s2518_s9 }
 0x257   :  { %18 = sbr.rel (!%p16_p5) target bundleno = 9 (0x9), region = 276 }
 0x25c   :  { %1676 = vsyncpa [#allocation7], 1 }
 0x25d   :  { %1678 = vsyncpa [#allocation7 + $0x1], 1 }
 0x25e   :  { %1679 = vsyncpa [#allocation9], 1 }

</bundles_post_ra>
